<compile_context>
chip_gen: v5e
topology: v5e:2x2
jax: 0.10.0
libtpu: 0.0.40
codegen_flags: <defaults>
</compile_context>

<pallas_src>
import jax
import jax.numpy as jnp
from jax.experimental import pallas as pl
from jax.experimental.pallas import tpu as pltpu


def _conv1x1_kernel(x_ref, w_ref, b_ref, o_ref):
    # x_ref: (C, t_hw)   w_ref: (D, C)   b_ref: (D, 1)   o_ref: (D, t_hw)
    acc = jnp.dot(w_ref[...], x_ref[...], preferred_element_type=jnp.float32)
    o_ref[...] = (acc + b_ref[...]).astype(o_ref.dtype)


def conv1x1_nchw(x3, w_dc, b_d, *, max_tile_hw=2048):
    """x3: (N, C, HW) f32, w_dc: (D, C), b_d: (D,) -> (N, D, HW)."""
    N, C, HW = x3.shape
    D = w_dc.shape[0]
    b2 = b_d.reshape(D, 1)

    # Tile the HW axis.  Single block when small; otherwise large 128-multiple
    # tiles with a clamped (masked) tail block — no divisibility requirement.
    if HW <= max_tile_hw:
        t_hw = HW
    else:
        t_hw = max_tile_hw  # multiple of 128
    n_hw = pl.cdiv(HW, t_hw)

    cost = pl.CostEstimate(
        flops=2 * N * HW * C * D,
        transcendentals=0,
        bytes_accessed=4 * (N * C * HW + D * C + D + N * D * HW),
    )

    return pl.pallas_call(
        _conv1x1_kernel,
        out_shape=jax.ShapeDtypeStruct((N, D, HW), x3.dtype),
        grid_spec=pltpu.PrefetchScalarGridSpec(
            num_scalar_prefetch=0,
            grid=(N, n_hw),
            in_specs=[
                # activations: batch squeezed, full C on sublanes, HW tile on lanes
                pl.BlockSpec((None, C, t_hw), lambda n, j: (n, 0, j)),
                # weight: whole (D, C), resident across the grid
                pl.BlockSpec((D, C), lambda n, j: (0, 0)),
                # bias: (D, 1), broadcast over HW inside the kernel
                pl.BlockSpec((D, 1), lambda n, j: (0, 0)),
            ],
            out_specs=pl.BlockSpec((None, D, t_hw), lambda n, j: (n, 0, j)),
        ),
        compiler_params=pltpu.CompilerParams(
            dimension_semantics=("parallel", "parallel"),
        ),
        cost_estimate=cost,
    )(x3, w_dc, b2)


def token_embedding_forward(x_nchw, weight_oc, bias_o):
    """Equivalent of TokenEmbedding.forward.

    x_nchw:    (N, c_in, H, W)     float32
    weight_oc: (d_model, c_in)     (PyTorch Conv2d weight squeezed of its 1x1 dims)
    bias_o:    (d_model,)
    returns    (N, d_model, H, W)  float32
    """
    N, C, H, W = x_nchw.shape
    D = weight_oc.shape[0]
    x3 = x_nchw.reshape(N, C, H * W)          # free reshape, no transpose
    out3 = conv1x1_nchw(x3, weight_oc, bias_o)  # (N, D, H*W)
    return out3.reshape(N, D, H, W)           # free reshape, no transpose


if __name__ == "__main__":
    # Small shapes consistent with the module: batch=2, c_in=4, spatial=16, d_model=32.
    N, C_IN, H, W, D_MODEL = 2, 4, 16, 16, 32

    key = jax.random.PRNGKey(0)
    kx, kw, kb = jax.random.split(key, 3)

    x = jax.random.normal(kx, (N, C_IN, H, W), dtype=jnp.float32)

    # Conv2d weight is (d_model, c_in, 1, 1); store squeezed as (d_model, c_in).
    # PyTorch default init is kaiming_uniform(a=sqrt(5)) -> bound = 1/sqrt(fan_in).
    fan_in = C_IN  # kernel is 1x1
    bound = 1.0 / jnp.sqrt(fan_in)
    weight = jax.random.uniform(kw, (D_MODEL, C_IN), dtype=jnp.float32,
                                minval=-bound, maxval=bound)
    bias = jax.random.uniform(kb, (D_MODEL,), dtype=jnp.float32,
                              minval=-bound, maxval=bound)

    fwd = jax.jit(token_embedding_forward)
    out = fwd(x, weight, bias)
    jax.block_until_ready(out)

    # Reference check in plain JAX (1x1 conv == einsum over channel axis).
    ref = jnp.einsum("nchw,oc->nohw", x, weight) + bias[None, :, None, None]
    assert out.shape == (N, D_MODEL, H, W)
    assert jnp.allclose(out, ref, atol=1e-5, rtol=1e-5)

    print("KERNEL_OK")
</pallas_src>

<mosaic_0001>
module attributes {stable_mosaic.version = 11 : i64} {
  func.func @_conv1x1_kernel(%arg0: i32, %arg1: i32, %arg2: memref<1x4x256xf32, #tpu.memory_space<vmem>>, %arg3: memref<32x4xf32, #tpu.memory_space<vmem>>, %arg4: memref<32x1xf32, #tpu.memory_space<vmem>>, %arg5: memref<1x32x256xf32, #tpu.memory_space<vmem>>) attributes {dimension_semantics = [#tpu.dimension_semantics<parallel>, #tpu.dimension_semantics<parallel>], iteration_bounds = array<i64: 2, 1>, scalar_prefetch = 0 : i64, scratch_operands = 0 : i64, tpu.core_type = #tpu.core_type<tc>, window_params = [{transform_indices = @transform_0, window_bounds = array<i64: 1, 4, 256>}, {pipeline_mode = #tpu.pipeline_mode<synchronous>, transform_indices = @transform_1, window_bounds = array<i64: 32, 4>}, {pipeline_mode = #tpu.pipeline_mode<synchronous>, transform_indices = @transform_2, window_bounds = array<i64: 32, 1>}, {transform_indices = @transform_3, window_bounds = array<i64: 1, 32, 256>}]} {
    %c0 = arith.constant 0 : index
    %c0_0 = arith.constant 0 : index
    %0 = vector.load %arg3[%c0, %c0_0] : memref<32x4xf32, #tpu.memory_space<vmem>>, vector<32x4xf32>
    %c0_1 = arith.constant 0 : index
    %c0_2 = arith.constant 0 : index
    %c0_3 = arith.constant 0 : index
    %1 = vector.load %arg2[%c0_1, %c0_2, %c0_3] : memref<1x4x256xf32, #tpu.memory_space<vmem>>, vector<1x4x256xf32>
    %2 = vector.shape_cast %1 : vector<1x4x256xf32> to vector<4x256xf32>
    %cst = arith.constant dense<0.000000e+00> : vector<32x256xf32>
    %3 = tpu.matmul %0, %2, %cst {dimension_numbers = #tpu.dot_dimension_numbers<[1], [0], [0], [1], [0, 0, 1, 1], [], []>} : vector<32x4xf32>, vector<4x256xf32>, vector<32x256xf32> -> vector<32x256xf32>
    %c0_4 = arith.constant 0 : index
    %c0_5 = arith.constant 0 : index
    %4 = vector.load %arg4[%c0_4, %c0_5] : memref<32x1xf32, #tpu.memory_space<vmem>>, vector<32x1xf32>
    %5 = vector.broadcast %4 : vector<32x1xf32> to vector<32x256xf32>
    %6 = arith.addf %3, %5 : vector<32x256xf32>
    %c0_6 = arith.constant 0 : index
    %c0_7 = arith.constant 0 : index
    %c0_8 = arith.constant 0 : index
    %7 = vector.load %arg5[%c0_6, %c0_7, %c0_8] : memref<1x32x256xf32, #tpu.memory_space<vmem>>, vector<1x32x256xf32>
    %8 = vector.shape_cast %7 : vector<1x32x256xf32> to vector<32x256xf32>
    %9 = vector.shape_cast %6 : vector<32x256xf32> to vector<1x32x256xf32>
    tpu.vector_store %arg5[%c0_6, %c0_7, %c0_8], %9 {strides = array<i32>} : memref<1x32x256xf32, #tpu.memory_space<vmem>>, vector<1x32x256xf32>,
    return
  }
  func.func @transform_0(%arg0: i32, %arg1: i32) -> (i32, i32, i32) {
    %c0_i32 = arith.constant 0 : i32
    %c0_i32_0 = arith.constant 0 : i32
    return %arg0, %c0_i32, %arg1 : i32, i32, i32
  }
  func.func @transform_1(%arg0: i32, %arg1: i32) -> (i32, i32) {
    %c0_i32 = arith.constant 0 : i32
    %c0_i32_0 = arith.constant 0 : i32
    %c0_i32_1 = arith.constant 0 : i32
    return %c0_i32, %c0_i32_0 : i32, i32
  }
  func.func @transform_2(%arg0: i32, %arg1: i32) -> (i32, i32) {
    %c0_i32 = arith.constant 0 : i32
    %c0_i32_0 = arith.constant 0 : i32
    %c0_i32_1 = arith.constant 0 : i32
    return %c0_i32, %c0_i32_0 : i32, i32
  }
  func.func @transform_3(%arg0: i32, %arg1: i32) -> (i32, i32, i32) {
    %c0_i32 = arith.constant 0 : i32
    %c0_i32_0 = arith.constant 0 : i32
    return %arg0, %c0_i32, %arg1 : i32, i32, i32
  }
}

</mosaic_0001>

<bundles_post_ra>
// kernel: token_embedding_forward.1
= control target key start
LH: loop header
LB: loop body
LE: loop exit
PB: predicated region body
PF: predicated region fallthrough
CT: control target
= control target key end

     0   :  { %s511_s12 = smov 0   ;;  %s513_s13 = smov 0   ;;  %s580_s0 = inlined_call_operand.vmem [shape: f32[2,4,256], index: 0, kind: input, shape index: {}]   ;;  %s581_s1 = inlined_call_operand.vmem [shape: f32[32,4], index: 1, kind: input, shape index: {}]   ;;  %s582_s2 = inlined_call_operand.vmem [shape: f32[32,1], index: 2, kind: input, shape index: {}]   ;;  %s583_s3 = inlined_call_operand.vmem [shape: f32[2,32,256], index: 3, kind: output, shape index: {}]  }
   0x1   :  { %s515_s14 = smov 0  }
   0x2 LB: > { %s25_s15 = sadd.s32 1, %s484_s13  ;;  %p418_p0 = scmp.ge.s32.totalorder %s488_s14, 1  ;;  %s488_s14 = sphi %s515_s14, %s13_s14   ;;  %s484_s13 = sphi %s513_s13, %s585_s13   ;;  %s480_s12 = sphi %s511_s12, %s584_s12  }
   0x3   : > { %p27_p1 = scmp.ge.s32.totalorder %s25_s15, 2  ;;  %p158_p2 = scmp.lt.s32.totalorder %s488_s14, 3 }
   0x5   : > { %s587_s15 = smov (%p27_p1, %s25_s15), 0  ;;  %p159_p3 = pnand %p418_p0, %p158_p2 }
   0x6   : > { %p191_p4 = scmp.lt.s32.totalorder (!%p159_p3), %s480_s12, 1 }
   0x7   : > { %162 = sbr.rel (%p159_p3) target bundleno = 170 (0xaa), region = 32 }
   0xc   : > { %v490_v0 = vmov 0   ;;  %v217_v1 = vld [vmem:[%s582_s2 + $0x10] sm:$0xff]  ;;  %s589_s12 = smov (!%p191_p4, %s480_s12), 1  ;;  %v215_v2 = vld [vmem:[%s582_s2] sm:$0xff]  ;;  %v218_v4 = vld [vmem:[%s582_s2 + $0x18] sm:$0xff]  ;;  %vm256_vm0 = vcmask 1043456  }
   0xd   : > { %465 = vset.pattern.permute.xlu1 %v490_v0  ;;  %464 = vset.pattern.permute.xlu0 %v490_v0  ;;  %s435_s20 = sshll.u32 %s589_s12, 3  ;;  %v216_v5 = vld [vmem:[%s582_s2 + $0x8] sm:$0xff]  ;;  %v210_v6 = vld [vmem:[%s581_s1] sm:$0xff]  ;;  %vm243_vm1 = vcmask 31744   ;;  %v212_v7 = vld [vmem:[%s581_s1 + $0x10] sm:$0xff]  ;;  %s436_s9 = sshll.u32 %s589_s12, 6 }
   0xe   : > { %231 = vperm.xlu1 %465, %v217_v1   ;;  %221 = vperm.xlu0 %464, %v215_v2   ;;  %s198_s23 = scalar_lea.vmem %s580_s0, %s435_s20  ;;  %v211_v10 = vld [vmem:[%s581_s1 + $0x8] sm:$0xff]  ;;  %v213_v11 = vld [vmem:[%s581_s1 + $0x18] sm:$0xff]  ;;  %s208_s16 = scalar_lea.vmem %s583_s3, %s436_s9 }
   0xf   : > { %v214_v3 = vld [vmem:[%s198_s23] sm:$0xff] }
  0x10   : > { %240 = vst [vmem:[#allocation1] ss:$2 sm:$0xff] %v214_v3 }
  0x16   : > { %236 = vperm.xlu1 %465, %v218_v4   ;;  %226 = vperm.xlu0 %464, %v216_v5  }
  0x17   : > { %v241_v8 = vld.sshfl [vmem:[#allocation1] sm:$0xff pattern:$0x75316420]  ;;  %v242_v9 = vld.sshfl [vmem:[#allocation1 + $0x8] sm:$0xff pattern:$0x75316420] }
  0x18   : > { %423 = vmatpush.msk.msra.mxu0 %vm256_vm0, %v241_v8  ;;  %437 = vmatpush.msk.msra.mxu2 %vm256_vm0, %v241_v8 }
  0x19   : > { %428 = vmatpush.msk.msra.mxu1 %vm256_vm0, %v242_v9  ;;  %438 = vmatpush.msk.msra.mxu3 %vm256_vm0, %v242_v9 }
  0x1a   : > { %424 = vmatmul.msk.f32.vlgmr.msra.gmra.mxu0 %vm243_vm1, %v210_v6  ;;  %426 = vmatmul.msk.f32.vlgmr.msra.gmra.mxu2 %vm243_vm1, %v212_v7 }
  0x1b   : > { %429 = vmatmul.msk.f32.vlgmr.msra.gmra.mxu1 %vm243_vm1, %v210_v6  ;;  %431 = vmatmul.msk.f32.vlgmr.msra.gmra.mxu3 %vm243_vm1, %v212_v7 }
  0x22   : > { %425 = vmatmul.msk.f32.gmra.mxu0 %vm243_vm1, %v211_v10  ;;  %427 = vmatmul.msk.f32.gmra.mxu2 %vm243_vm1, %v213_v11 }
  0x23   : > { %430 = vmatmul.msk.f32.gmra.mxu1 %vm243_vm1, %v211_v10  ;;  %432 = vmatmul.msk.f32.gmra.mxu3 %vm243_vm1, %v213_v11 }
  0x80   : > { %v222_v12 = vpop.permute.xlu0 %221  ;;  %v232_v17 = vpop.permute.xlu1 %231 }
  0x88   : > { %v227_v21 = vpop.permute.xlu0 %226  ;;  %v237_v27 = vpop.permute.xlu1 %236 }
  0x97   : > { %v278_v13 = vpop.f32.mrf.mxu0 }
  0x98   : > { %v279_v14 = vadd.f32 %v278_v13, %v222_v12  ;;  %v307_v15 = vpop.f32.mrf.mxu1 }
  0x99   : > { %v308_v16 = vadd.f32 %v307_v15, %v222_v12 }
  0x9a   : > { %319 = vst [vmem:[%s208_s16] sm:$0xff] %v279_v14 }
  0x9b   : > { %320 = vst [vmem:[%s208_s16 + $0x8] sm:$0xff] %v308_v16 }
  0x9d   : > { %v284_v18 = vpop.f32.mrf.mxu2 }
  0x9e   : > { %v285_v19 = vadd.f32 %v284_v18, %v232_v17  ;;  %v313_v20 = vpop.f32.mrf.mxu3 }
  0x9f   : > { %v314_v22 = vadd.f32 %v313_v20, %v232_v17  ;;  %v281_v23 = vpop.f32.mrf.mxu0 }
  0xa0   : > { %323 = vst [vmem:[%s208_s16 + $0x20] sm:$0xff] %v285_v19  ;;  %v282_v24 = vadd.f32 %v281_v23, %v227_v21  ;;  %v310_v25 = vpop.f32.mrf.mxu1 }
  0xa1   : > { %324 = vst [vmem:[%s208_s16 + $0x28] sm:$0xff] %v314_v22  ;;  %v311_v26 = vadd.f32 %v310_v25, %v227_v21 }
  0xa2   : > { %321 = vst [vmem:[%s208_s16 + $0x10] sm:$0xff] %v282_v24 }
  0xa3   : > { %322 = vst [vmem:[%s208_s16 + $0x18] sm:$0xff] %v311_v26 }
  0xa5   : > { %v287_v28 = vpop.f32.mrf.mxu2 }
  0xa6   : > { %v288_v29 = vadd.f32 %v287_v28, %v237_v27  ;;  %v316_v30 = vpop.f32.mrf.mxu3 }
  0xa7   : > { %v317_v31 = vadd.f32 %v316_v30, %v237_v27 }
  0xa8   : > { %325 = vst [vmem:[%s208_s16 + $0x30] sm:$0xff] %v288_v29 }
  0xa9   : > { %326 = vst [vmem:[%s208_s16 + $0x38] sm:$0xff] %v317_v31 }
  0xaa PF: > { %s13_s14 = sadd.s32 1, %s488_s14   ;;  %s584_s12 = smov %s484_s13 }
  0xab   : > { %p10_p5 = scmp.ge.s32.totalorder %s13_s14, 4   ;;  %s585_s13 = smov %s587_s15 }
  0xad   :  { %12 = sbr.rel (!%p10_p5) target bundleno = 2 (0x2), region = 62 }

</bundles_post_ra>
